<compile_context>
chip_gen: v5e
topology: v5e:2x2
jax: 0.10.0
libtpu: 0.0.40
codegen_flags: <defaults>
</compile_context>

<pallas_src>
import functools

import jax
import jax.numpy as jnp
from jax.experimental import pallas as pl
from jax.experimental.pallas import tpu as pltpu

LN_EPS = 1e-5
_HC_CHUNK = 512          # channel-mix hidden chunk (multiple of 128)
_MAX_BATCH_TILE = 8      # cap on static token-mix unroll per grid step


def _layernorm(x, gamma, beta):
    # Single-pass LayerNorm: E[x] and E[x^2] computed together, gamma folded
    # into the rsqrt scale.  (rows, D) f32 in, f32 out.
    mu = jnp.mean(x, axis=-1, keepdims=True)
    msq = jnp.mean(x * x, axis=-1, keepdims=True)
    inv = jax.lax.rsqrt(msq - mu * mu + LN_EPS)
    return (x - mu) * (inv * gamma) + beta


def mixer_kernel(
    x_ref,                      # (R, D) input rows, R = TB*N (read at d == 0 only)
    gt_ref, bt_ref,             # token-mix LayerNorm(dim): (1, D) f32
    w1t_ref, b1t_ref,           # token FF linear1: (N, Ht) bf16, (Ht, 1) f32
    w2t_ref, b2t_ref,           # token FF linear2: (Ht, N) bf16, (N, 1) f32
    gc_ref, bc_ref,             # channel-mix LayerNorm(dim): (1, D) f32
    w1c_ref, b1c_ref,           # channel FF linear1: (D, Hc) bf16, (1, Hc) f32
    w2c_ref, b2c_ref,           # channel FF linear2: (Hc, D) bf16, (1, D) f32
    gf_ref, bf_ref,             # shared final LayerNorm(dim): (1, D) f32
    o_ref,                      # (R, D) f32: VMEM-resident activation across depth
    *, batch_tile, num_patch, hc_chunk,
):
    d = pl.program_id(1)
    N = num_patch

    @pl.when(d == 0)
    def _():
        o_ref[...] = x_ref[...].astype(jnp.float32)

    x = o_ref[...]                                            # (R, D) f32

    # ---- token mixing: x = x + FF_token( LN(x) ) over the patch axis -----
    xt = _layernorm(x, gt_ref[...], bt_ref[...]).astype(jnp.bfloat16)
    w1t = w1t_ref[...]
    w2t = w2t_ref[...]
    b1t = b1t_ref[...]
    b2t = b2t_ref[...]
    tmix_parts = []
    for b in range(batch_tile):                               # static unroll
        xb = xt[b * N:(b + 1) * N, :]                         # (N, D) bf16
        # h[h, d] = sum_n w1t[n, h] * xb[n, d]   (no activation transpose)
        h = jax.lax.dot_general(
            w1t, xb, dimension_numbers=(((0,), (0,)), ((), ())),
            preferred_element_type=jnp.float32) + b1t         # (Ht, D) f32
        h = jax.nn.gelu(h, approximate=True).astype(jnp.bfloat16)
        # t[n, d] = sum_h w2t[h, n] * h[h, d]
        t = jax.lax.dot_general(
            w2t, h, dimension_numbers=(((0,), (0,)), ((), ())),
            preferred_element_type=jnp.float32) + b2t         # (N, D) f32
        tmix_parts.append(t)
    tmix = tmix_parts[0] if batch_tile == 1 else jnp.concatenate(tmix_parts, axis=0)
    x = x + tmix                                              # (R, D)

    # ---- channel mixing: x = x + FF_channel( LN(x) ), Hc-chunked ----------
    xc = _layernorm(x, gc_ref[...], bc_ref[...]).astype(jnp.bfloat16)   # (R, D)
    Hc = w1c_ref.shape[-1]
    ch = jnp.zeros_like(x)
    for cs in range(0, Hc, hc_chunk):
        csz = min(hc_chunk, Hc - cs)
        hc = jnp.dot(xc, w1c_ref[:, cs:cs + csz],
                     preferred_element_type=jnp.float32) + b1c_ref[:, cs:cs + csz]
        hc = jax.nn.gelu(hc, approximate=True).astype(jnp.bfloat16)
        ch = ch + jnp.dot(hc, w2c_ref[cs:cs + csz, :],
                          preferred_element_type=jnp.float32)
    x = x + ch + b2c_ref[...]

    # ---- shared final LayerNorm (applied after every block, as in the
    # PyTorch module's depth loop) ------------------------------------------
    o_ref[...] = _layernorm(x, gf_ref[...], bf_ref[...])


def _physical_vmem_bytes():
    try:
        info = pltpu.get_tpu_info()
        v = getattr(info, "vmem_capacity_bytes", None)
        if v:
            return int(v)
    except Exception:
        pass
    return 64 << 20  # conservative (v7x per-TensorCore VMEM)


def mlp_mixer_forward(x, blocks_params, final_ln_params, *, batch_tile=None):
    """Full MLPMixer forward in one depth-fused pallas_call."""
    B, N, D = x.shape
    depth = len(blocks_params)
    gf, bf = final_ln_params

    # --- layout plumbing on the host/XLA side -----------------------------
    def stack(i, dtype=None, reshape_col=False):
        arrs = [bp[i] for bp in blocks_params]
        if reshape_col:                        # (1, H) -> (H, 1) column bias
            arrs = [a.reshape(-1, 1) for a in arrs]
        out = jnp.stack(arrs, axis=0)
        return out.astype(dtype) if dtype is not None else out

    gt = stack(0); bt = stack(1)
    w1t = stack(2, jnp.bfloat16)                  # (depth, N, Ht)
    b1t = stack(3, reshape_col=True)              # (depth, Ht, 1)
    w2t = stack(4, jnp.bfloat16)                  # (depth, Ht, N)
    b2t = stack(5, reshape_col=True)              # (depth, N, 1)
    gc = stack(6); bc = stack(7)
    w1c = stack(8, jnp.bfloat16)                  # (depth, D, Hc)
    b1c = stack(9)                                # (depth, 1, Hc)
    w2c = stack(10, jnp.bfloat16)                 # (depth, Hc, D)
    b2c = stack(11)                               # (depth, 1, D)

    Ht = w1t.shape[-1]
    Hc = w1c.shape[-1]
    hc_chunk = min(_HC_CHUNK, Hc)

    stacked = (gt, bt, w1t, b1t, w2t, b2t, gc, bc, w1c, b1c, w2c, b2c)
    per_step_param_bytes = sum(
        (int(p.size) // depth) * p.dtype.itemsize for p in stacked)
    shared_bytes = (int(gf.size) + int(bf.size)) * 4

    # --- VMEM budget (single-counted buffering) and batch-tile selection ---
    def need_bytes(tb):
        rows = tb * N
        x_block = rows * D * x.dtype.itemsize          # input tile
        o_block = rows * D * 4                         # resident f32 output
        inter = 4 * (rows * hc_chunk + Ht * D + 4 * rows * D)  # f32 temps
        return (2 * per_step_param_bytes               # weights, double-buffered
                + 2 * x_block                          # input, double-buffered
                + o_block
                + 2 * shared_bytes
                + inter)

    cap = max(_physical_vmem_bytes() - (16 << 20), 24 << 20)

    if batch_tile is None:
        batch_tile = 1
        for cand in range(min(B, _MAX_BATCH_TILE), 0, -1):
            if B % cand == 0 and need_bytes(cand) <= cap:
                batch_tile = cand
                break
    TB = batch_tile
    assert B % TB == 0, "batch_tile must divide batch size"
    vmem_limit = int(min(cap, max(need_bytes(TB) + (8 << 20), 32 << 20)))

    R = TB * N
    x2d = x.reshape(B * N, D)           # flat (rows, D) slab; free reshape

    # --- BlockSpecs --------------------------------------------------------
    def dspec(arr):
        # one depth slice per grid step, leading depth dim squeezed out
        return pl.BlockSpec((None,) + arr.shape[1:],
                            lambda b, d, _nd=arr.ndim: (d,) + (0,) * (_nd - 1))

    def shared_spec(arr):
        return pl.BlockSpec(arr.shape, lambda b, d, _nd=arr.ndim: (0,) * _nd)

    x_spec = pl.BlockSpec((R, D), lambda b, d: (b, 0))
    out_spec = pl.BlockSpec((R, D), lambda b, d: (b, 0))   # constant in d -> resident

    in_specs = ([x_spec] + [dspec(p) for p in stacked]
                + [shared_spec(gf), shared_spec(bf)])

    kernel = functools.partial(mixer_kernel, batch_tile=TB, num_patch=N,
                               hc_chunk=hc_chunk)

    out2d = pl.pallas_call(
        kernel,
        out_shape=jax.ShapeDtypeStruct((B * N, D), jnp.float32),
        grid_spec=pltpu.PrefetchScalarGridSpec(
            num_scalar_prefetch=0,
            grid=(B // TB, depth),          # batch tiles (parallel), depth (arbitrary)
            in_specs=in_specs,
            out_specs=out_spec,
        ),
        compiler_params=pltpu.CompilerParams(
            dimension_semantics=("parallel", "arbitrary"),
            vmem_limit_bytes=vmem_limit,
        ),
    )(x2d, *stacked, gf, bf)

    return out2d.reshape(B, N, D).astype(x.dtype)


# -------------------------- parameter construction --------------------------
def init_params(key, dim, num_patch, token_dim_factor, channel_dim_factor, depth):
    tok_hidden = num_patch * token_dim_factor
    chan_hidden = dim * channel_dim_factor

    blocks = []
    keys = jax.random.split(key, depth * 4 + 1)
    for d in range(depth):
        k1, k2, k3, k4 = keys[4 * d: 4 * d + 4]
        gt = jnp.ones((1, dim), jnp.float32)
        bt = jnp.zeros((1, dim), jnp.float32)
        w1t = jax.random.normal(k1, (num_patch, tok_hidden), jnp.float32) * 0.1
        b1t = jnp.zeros((1, tok_hidden), jnp.float32)
        w2t = jax.random.normal(k2, (tok_hidden, num_patch), jnp.float32) * 0.1
        b2t = jnp.zeros((1, num_patch), jnp.float32)
        gc = jnp.ones((1, dim), jnp.float32)
        bc = jnp.zeros((1, dim), jnp.float32)
        w1c = jax.random.normal(k3, (dim, chan_hidden), jnp.float32) * 0.1
        b1c = jnp.zeros((1, chan_hidden), jnp.float32)
        w2c = jax.random.normal(k4, (chan_hidden, dim), jnp.float32) * 0.1
        b2c = jnp.zeros((1, dim), jnp.float32)
        blocks.append((gt, bt, w1t, b1t, w2t, b2t, gc, bc, w1c, b1c, w2c, b2c))

    gf = jnp.ones((1, dim), jnp.float32)
    bf = jnp.zeros((1, dim), jnp.float32)
    return blocks, (gf, bf)


# ----------------------------- pure-JAX reference ----------------------------
def reference_forward(x, blocks_params, final_ln_params):
    # f32 reference matching the PyTorch module semantics exactly (erf GELU).
    def ln(x, g, b):
        mu = jnp.mean(x, axis=-1, keepdims=True)
        var = jnp.mean((x - mu) ** 2, axis=-1, keepdims=True)
        return (x - mu) * jax.lax.rsqrt(var + LN_EPS) * g + b

    gf, bf = final_ln_params
    for (gt, bt, w1t, b1t, w2t, b2t, gc, bc, w1c, b1c, w2c, b2c) in blocks_params:
        t = jnp.swapaxes(ln(x, gt, bt), 1, 2)                    # (B, D, N)
        t = jax.nn.gelu(t @ w1t + b1t, approximate=False) @ w2t + b2t
        x = x + jnp.swapaxes(t, 1, 2)
        c = ln(x, gc, bc)
        x = x + jax.nn.gelu(c @ w1c + b1c, approximate=False) @ w2c + b2c
        x = ln(x, gf, bf)                                        # applied every block
    return x


if __name__ == "__main__":
    # small shapes consistent with the module's forward: x is [batch, num_patch, dim]
    B, N, D = 2, 8, 32
    token_dim_factor, channel_dim_factor, depth = 2, 4, 2

    key = jax.random.PRNGKey(0)
    kx, kp = jax.random.split(key)
    x = jax.random.normal(kx, (B, N, D), jnp.float32)
    blocks_params, final_ln_params = init_params(
        kp, D, N, token_dim_factor, channel_dim_factor, depth
    )

    out = jax.block_until_ready(mlp_mixer_forward(x, blocks_params, final_ln_params))

    ref = reference_forward(x, blocks_params, final_ln_params)
    assert out.shape == (B, N, D)
    # bf16 MXU inputs + tanh-GELU with f32 accumulation -> loosened tolerance.
    assert jnp.allclose(out, ref, atol=5e-2, rtol=5e-2), float(
        jnp.max(jnp.abs(out - ref)))

    print("KERNEL_OK")
</pallas_src>

<mosaic_0001>
module attributes {stable_mosaic.version = 11 : i64} {
  func.func @mixer_kernel(%arg0: i32, %arg1: i32, %arg2: memref<16x32xf32, #tpu.memory_space<vmem>>, %arg3: memref<1x1x32xf32, #tpu.memory_space<vmem>>, %arg4: memref<1x1x32xf32, #tpu.memory_space<vmem>>, %arg5: memref<1x8x16xbf16, #tpu.memory_space<vmem>>, %arg6: memref<1x16x1xf32, #tpu.memory_space<vmem>>, %arg7: memref<1x16x8xbf16, #tpu.memory_space<vmem>>, %arg8: memref<1x8x1xf32, #tpu.memory_space<vmem>>, %arg9: memref<1x1x32xf32, #tpu.memory_space<vmem>>, %arg10: memref<1x1x32xf32, #tpu.memory_space<vmem>>, %arg11: memref<1x32x128xbf16, #tpu.memory_space<vmem>>, %arg12: memref<1x1x128xf32, #tpu.memory_space<vmem>>, %arg13: memref<1x128x32xbf16, #tpu.memory_space<vmem>>, %arg14: memref<1x1x32xf32, #tpu.memory_space<vmem>>, %arg15: memref<1x32xf32, #tpu.memory_space<vmem>>, %arg16: memref<1x32xf32, #tpu.memory_space<vmem>>, %arg17: memref<16x32xf32, #tpu.memory_space<vmem>>) attributes {dimension_semantics = [#tpu.dimension_semantics<parallel>, #tpu.dimension_semantics<arbitrary>], iteration_bounds = array<i64: 1, 2>, scalar_prefetch = 0 : i64, scratch_operands = 0 : i64, tpu.core_type = #tpu.core_type<tc>, window_params = [{transform_indices = @transform_0, window_bounds = array<i64: 16, 32>}, {transform_indices = @transform_1, window_bounds = array<i64: 1, 1, 32>}, {transform_indices = @transform_2, window_bounds = array<i64: 1, 1, 32>}, {transform_indices = @transform_3, window_bounds = array<i64: 1, 8, 16>}, {transform_indices = @transform_4, window_bounds = array<i64: 1, 16, 1>}, {transform_indices = @transform_5, window_bounds = array<i64: 1, 16, 8>}, {transform_indices = @transform_6, window_bounds = array<i64: 1, 8, 1>}, {transform_indices = @transform_7, window_bounds = array<i64: 1, 1, 32>}, {transform_indices = @transform_8, window_bounds = array<i64: 1, 1, 32>}, {transform_indices = @transform_9, window_bounds = array<i64: 1, 32, 128>}, {transform_indices = @transform_10, window_bounds = array<i64: 1, 1, 128>}, {transform_indices = @transform_11, window_bounds = array<i64: 1, 128, 32>}, {transform_indices = @transform_12, window_bounds = array<i64: 1, 1, 32>}, {pipeline_mode = #tpu.pipeline_mode<synchronous>, transform_indices = @transform_13, window_bounds = array<i64: 1, 32>}, {pipeline_mode = #tpu.pipeline_mode<synchronous>, transform_indices = @transform_14, window_bounds = array<i64: 1, 32>}, {transform_indices = @transform_15, window_bounds = array<i64: 16, 32>}]} {
    %c0_i32 = arith.constant 0 : i32
    %0 = arith.cmpi eq, %arg1, %c0_i32 : i32
    %1 = arith.extui %0 : i1 to i32
    %c0_i32_0 = arith.constant 0 : i32
    %2 = arith.cmpi ne, %1, %c0_i32_0 : i32
    scf.if %2 {
      %c0_77 = arith.constant 0 : index
      %c0_78 = arith.constant 0 : index
      %166 = vector.load %arg2[%c0_77, %c0_78] : memref<16x32xf32, #tpu.memory_space<vmem>>, vector<16x32xf32>
      %c0_79 = arith.constant 0 : index
      %c0_80 = arith.constant 0 : index
      %167 = vector.load %arg17[%c0_79, %c0_80] : memref<16x32xf32, #tpu.memory_space<vmem>>, vector<16x32xf32>
      tpu.vector_store %arg17[%c0_79, %c0_80], %166 {strides = array<i32>} : memref<16x32xf32, #tpu.memory_space<vmem>>, vector<16x32xf32>,
    } else {
    }
    %c0 = arith.constant 0 : index
    %c0_1 = arith.constant 0 : index
    %3 = vector.load %arg17[%c0, %c0_1] : memref<16x32xf32, #tpu.memory_space<vmem>>, vector<16x32xf32>
    %c0_2 = arith.constant 0 : index
    %c0_3 = arith.constant 0 : index
    %c0_4 = arith.constant 0 : index
    %4 = vector.load %arg3[%c0_2, %c0_3, %c0_4] : memref<1x1x32xf32, #tpu.memory_space<vmem>>, vector<1x1x32xf32>
    %5 = vector.shape_cast %4 : vector<1x1x32xf32> to vector<1x32xf32>
    %c0_5 = arith.constant 0 : index
    %c0_6 = arith.constant 0 : index
    %c0_7 = arith.constant 0 : index
    %6 = vector.load %arg4[%c0_5, %c0_6, %c0_7] : memref<1x1x32xf32, #tpu.memory_space<vmem>>, vector<1x1x32xf32>
    %7 = vector.shape_cast %6 : vector<1x1x32xf32> to vector<1x32xf32>
    %cst = arith.constant dense<0.000000e+00> : vector<16xf32>
    %8 = vector.multi_reduction <add>, %3, %cst [1] : vector<16x32xf32> to vector<16xf32>
    %9 = vector.shape_cast %8 : vector<16xf32> to vector<16x1xf32>
    %cst_8 = arith.constant 3.200000e+01 : f32
    %10 = vector.broadcast %cst_8 : f32 to vector<16x1xf32>
    %11 = arith.divf %9, %10 : vector<16x1xf32>
    %12 = arith.mulf %3, %3 : vector<16x32xf32>
    %cst_9 = arith.constant dense<0.000000e+00> : vector<16xf32>
    %13 = vector.multi_reduction <add>, %12, %cst_9 [1] : vector<16x32xf32> to vector<16xf32>
    %14 = vector.shape_cast %13 : vector<16xf32> to vector<16x1xf32>
    %cst_10 = arith.constant 3.200000e+01 : f32
    %15 = vector.broadcast %cst_10 : f32 to vector<16x1xf32>
    %16 = arith.divf %14, %15 : vector<16x1xf32>
    %17 = arith.mulf %11, %11 : vector<16x1xf32>
    %18 = arith.subf %16, %17 : vector<16x1xf32>
    %cst_11 = arith.constant 9.99999974E-6 : f32
    %19 = vector.broadcast %cst_11 : f32 to vector<16x1xf32>
    %20 = arith.addf %18, %19 : vector<16x1xf32>
    %21 = math.rsqrt %20 : vector<16x1xf32>
    %22 = vector.broadcast %11 : vector<16x1xf32> to vector<16x32xf32>
    %23 = arith.subf %3, %22 : vector<16x32xf32>
    %24 = vector.broadcast %21 : vector<16x1xf32> to vector<16x32xf32>
    %25 = vector.broadcast %5 : vector<1x32xf32> to vector<16x32xf32>
    %26 = arith.mulf %24, %25 : vector<16x32xf32>
    %27 = arith.mulf %23, %26 : vector<16x32xf32>
    %28 = vector.broadcast %7 : vector<1x32xf32> to vector<16x32xf32>
    %29 = arith.addf %27, %28 : vector<16x32xf32>
    %30 = arith.truncf %29 : vector<16x32xf32> to vector<16x32xbf16>
    %c0_12 = arith.constant 0 : index
    %c0_13 = arith.constant 0 : index
    %c0_14 = arith.constant 0 : index
    %31 = vector.load %arg5[%c0_12, %c0_13, %c0_14] : memref<1x8x16xbf16, #tpu.memory_space<vmem>>, vector<1x8x16xbf16>
    %32 = vector.shape_cast %31 : vector<1x8x16xbf16> to vector<8x16xbf16>
    %c0_15 = arith.constant 0 : index
    %c0_16 = arith.constant 0 : index
    %c0_17 = arith.constant 0 : index
    %33 = vector.load %arg7[%c0_15, %c0_16, %c0_17] : memref<1x16x8xbf16, #tpu.memory_space<vmem>>, vector<1x16x8xbf16>
    %34 = vector.shape_cast %33 : vector<1x16x8xbf16> to vector<16x8xbf16>
    %c0_18 = arith.constant 0 : index
    %c0_19 = arith.constant 0 : index
    %c0_20 = arith.constant 0 : index
    %35 = vector.load %arg6[%c0_18, %c0_19, %c0_20] : memref<1x16x1xf32, #tpu.memory_space<vmem>>, vector<1x16x1xf32>
    %36 = vector.shape_cast %35 : vector<1x16x1xf32> to vector<16x1xf32>
    %c0_21 = arith.constant 0 : index
    %c0_22 = arith.constant 0 : index
    %c0_23 = arith.constant 0 : index
    %37 = vector.load %arg8[%c0_21, %c0_22, %c0_23] : memref<1x8x1xf32, #tpu.memory_space<vmem>>, vector<1x8x1xf32>
    %38 = vector.shape_cast %37 : vector<1x8x1xf32> to vector<8x1xf32>
    %39 = vector.extract_strided_slice %30 {offsets = [0, 0], sizes = [8, 32], strides = [1, 1]} : vector<16x32xbf16> to vector<8x32xbf16>
    %cst_24 = arith.constant dense<0.000000e+00> : vector<16x32xf32>
    %40 = tpu.matmul %32, %39, %cst_24 {dimension_numbers = #tpu.dot_dimension_numbers<[0], [0], [1], [1], [0, 1, 1, 1], [], []>} : vector<8x16xbf16>, vector<8x32xbf16>, vector<16x32xf32> -> vector<16x32xf32>
    %41 = vector.broadcast %36 : vector<16x1xf32> to vector<16x32xf32>
    %42 = arith.addf %40, %41 : vector<16x32xf32>
    %43 = arith.mulf %42, %42 : vector<16x32xf32>
    %44 = arith.mulf %42, %43 : vector<16x32xf32>
    %cst_25 = arith.constant 4.471500e-02 : f32
    %45 = vector.broadcast %cst_25 : f32 to vector<16x32xf32>
    %46 = arith.mulf %45, %44 : vector<16x32xf32>
    %47 = arith.addf %42, %46 : vector<16x32xf32>
    %cst_26 = arith.constant 0.797884583 : f32
    %48 = vector.broadcast %cst_26 : f32 to vector<16x32xf32>
    %49 = arith.mulf %48, %47 : vector<16x32xf32>
    %50 = math.tanh %49 : vector<16x32xf32>
    %cst_27 = arith.constant 1.000000e+00 : f32
    %51 = vector.broadcast %cst_27 : f32 to vector<16x32xf32>
    %52 = arith.addf %51, %50 : vector<16x32xf32>
    %cst_28 = arith.constant 5.000000e-01 : f32
    %53 = vector.broadcast %cst_28 : f32 to vector<16x32xf32>
    %54 = arith.mulf %53, %52 : vector<16x32xf32>
    %55 = arith.mulf %42, %54 : vector<16x32xf32>
    %56 = arith.truncf %55 : vector<16x32xf32> to vector<16x32xbf16>
    %cst_29 = arith.constant dense<0.000000e+00> : vector<8x32xf32>
    %57 = tpu.matmul %34, %56, %cst_29 {dimension_numbers = #tpu.dot_dimension_numbers<[0], [0], [1], [1], [0, 1, 1, 1], [], []>} : vector<16x8xbf16>, vector<16x32xbf16>, vector<8x32xf32> -> vector<8x32xf32>
    %58 = vector.broadcast %38 : vector<8x1xf32> to vector<8x32xf32>
    %59 = arith.addf %57, %58 : vector<8x32xf32>
    %60 = vector.extract_strided_slice %30 {offsets = [8, 0], sizes = [8, 32], strides = [1, 1]} : vector<16x32xbf16> to vector<8x32xbf16>
    %cst_30 = arith.constant dense<0.000000e+00> : vector<16x32xf32>
    %61 = tpu.matmul %32, %60, %cst_30 {dimension_numbers = #tpu.dot_dimension_numbers<[0], [0], [1], [1], [0, 1, 1, 1], [], []>} : vector<8x16xbf16>, vector<8x32xbf16>, vector<16x32xf32> -> vector<16x32xf32>
    %62 = vector.broadcast %36 : vector<16x1xf32> to vector<16x32xf32>
    %63 = arith.addf %61, %62 : vector<16x32xf32>
    %64 = arith.mulf %63, %63 : vector<16x32xf32>
    %65 = arith.mulf %63, %64 : vector<16x32xf32>
    %cst_31 = arith.constant 4.471500e-02 : f32
    %66 = vector.broadcast %cst_31 : f32 to vector<16x32xf32>
    %67 = arith.mulf %66, %65 : vector<16x32xf32>
    %68 = arith.addf %63, %67 : vector<16x32xf32>
    %cst_32 = arith.constant 0.797884583 : f32
    %69 = vector.broadcast %cst_32 : f32 to vector<16x32xf32>
    %70 = arith.mulf %69, %68 : vector<16x32xf32>
    %71 = math.tanh %70 : vector<16x32xf32>
    %cst_33 = arith.constant 1.000000e+00 : f32
    %72 = vector.broadcast %cst_33 : f32 to vector<16x32xf32>
    %73 = arith.addf %72, %71 : vector<16x32xf32>
    %cst_34 = arith.constant 5.000000e-01 : f32
    %74 = vector.broadcast %cst_34 : f32 to vector<16x32xf32>
    %75 = arith.mulf %74, %73 : vector<16x32xf32>
    %76 = arith.mulf %63, %75 : vector<16x32xf32>
    %77 = arith.truncf %76 : vector<16x32xf32> to vector<16x32xbf16>
    %cst_35 = arith.constant dense<0.000000e+00> : vector<8x32xf32>
    %78 = tpu.matmul %34, %77, %cst_35 {dimension_numbers = #tpu.dot_dimension_numbers<[0], [0], [1], [1], [0, 1, 1, 1], [], []>} : vector<16x8xbf16>, vector<16x32xbf16>, vector<8x32xf32> -> vector<8x32xf32>
    %79 = vector.broadcast %38 : vector<8x1xf32> to vector<8x32xf32>
    %80 = arith.addf %78, %79 : vector<8x32xf32>
    %81 = tpu.concatenate %59, %80 in 0 : vector<8x32xf32>, vector<8x32xf32> -> vector<16x32xf32>
    %82 = arith.addf %3, %81 : vector<16x32xf32>
    %c0_36 = arith.constant 0 : index
    %c0_37 = arith.constant 0 : index
    %c0_38 = arith.constant 0 : index
    %83 = vector.load %arg9[%c0_36, %c0_37, %c0_38] : memref<1x1x32xf32, #tpu.memory_space<vmem>>, vector<1x1x32xf32>
    %84 = vector.shape_cast %83 : vector<1x1x32xf32> to vector<1x32xf32>
    %c0_39 = arith.constant 0 : index
    %c0_40 = arith.constant 0 : index
    %c0_41 = arith.constant 0 : index
    %85 = vector.load %arg10[%c0_39, %c0_40, %c0_41] : memref<1x1x32xf32, #tpu.memory_space<vmem>>, vector<1x1x32xf32>
    %86 = vector.shape_cast %85 : vector<1x1x32xf32> to vector<1x32xf32>
    %cst_42 = arith.constant dense<0.000000e+00> : vector<16xf32>
    %87 = vector.multi_reduction <add>, %82, %cst_42 [1] : vector<16x32xf32> to vector<16xf32>
    %88 = vector.shape_cast %87 : vector<16xf32> to vector<16x1xf32>
    %cst_43 = arith.constant 3.200000e+01 : f32
    %89 = vector.broadcast %cst_43 : f32 to vector<16x1xf32>
    %90 = arith.divf %88, %89 : vector<16x1xf32>
    %91 = arith.mulf %82, %82 : vector<16x32xf32>
    %cst_44 = arith.constant dense<0.000000e+00> : vector<16xf32>
    %92 = vector.multi_reduction <add>, %91, %cst_44 [1] : vector<16x32xf32> to vector<16xf32>
    %93 = vector.shape_cast %92 : vector<16xf32> to vector<16x1xf32>
    %cst_45 = arith.constant 3.200000e+01 : f32
    %94 = vector.broadcast %cst_45 : f32 to vector<16x1xf32>
    %95 = arith.divf %93, %94 : vector<16x1xf32>
    %96 = arith.mulf %90, %90 : vector<16x1xf32>
    %97 = arith.subf %95, %96 : vector<16x1xf32>
    %cst_46 = arith.constant 9.99999974E-6 : f32
    %98 = vector.broadcast %cst_46 : f32 to vector<16x1xf32>
    %99 = arith.addf %97, %98 : vector<16x1xf32>
    %100 = math.rsqrt %99 : vector<16x1xf32>
    %101 = vector.broadcast %90 : vector<16x1xf32> to vector<16x32xf32>
    %102 = arith.subf %82, %101 : vector<16x32xf32>
    %103 = vector.broadcast %100 : vector<16x1xf32> to vector<16x32xf32>
    %104 = vector.broadcast %84 : vector<1x32xf32> to vector<16x32xf32>
    %105 = arith.mulf %103, %104 : vector<16x32xf32>
    %106 = arith.mulf %102, %105 : vector<16x32xf32>
    %107 = vector.broadcast %86 : vector<1x32xf32> to vector<16x32xf32>
    %108 = arith.addf %106, %107 : vector<16x32xf32>
    %109 = arith.truncf %108 : vector<16x32xf32> to vector<16x32xbf16>
    %cst_47 = arith.constant 0.000000e+00 : f32
    %110 = vector.broadcast %cst_47 : f32 to vector<16x32xf32>
    %c0_48 = arith.constant 0 : index
    %c0_49 = arith.constant 0 : index
    %c0_50 = arith.constant 0 : index
    %111 = vector.load %arg11[%c0_48, %c0_49, %c0_50] : memref<1x32x128xbf16, #tpu.memory_space<vmem>>, vector<1x32x128xbf16>
    %112 = vector.shape_cast %111 : vector<1x32x128xbf16> to vector<32x128xbf16>
    %cst_51 = arith.constant dense<0.000000e+00> : vector<16x128xf32>
    %113 = tpu.matmul %109, %112, %cst_51 {dimension_numbers = #tpu.dot_dimension_numbers<[1], [0], [0], [1], [0, 0, 1, 1], [], []>} : vector<16x32xbf16>, vector<32x128xbf16>, vector<16x128xf32> -> vector<16x128xf32>
    %c0_52 = arith.constant 0 : index
    %c0_53 = arith.constant 0 : index
    %c0_54 = arith.constant 0 : index
    %114 = vector.load %arg12[%c0_52, %c0_53, %c0_54] : memref<1x1x128xf32, #tpu.memory_space<vmem>>, vector<1x1x128xf32>
    %115 = vector.shape_cast %114 : vector<1x1x128xf32> to vector<1x128xf32>
    %116 = vector.broadcast %115 : vector<1x128xf32> to vector<16x128xf32>
    %117 = arith.addf %113, %116 : vector<16x128xf32>
    %118 = arith.mulf %117, %117 : vector<16x128xf32>
    %119 = arith.mulf %117, %118 : vector<16x128xf32>
    %cst_55 = arith.constant 4.471500e-02 : f32
    %120 = vector.broadcast %cst_55 : f32 to vector<16x128xf32>
    %121 = arith.mulf %120, %119 : vector<16x128xf32>
    %122 = arith.addf %117, %121 : vector<16x128xf32>
    %cst_56 = arith.constant 0.797884583 : f32
    %123 = vector.broadcast %cst_56 : f32 to vector<16x128xf32>
    %124 = arith.mulf %123, %122 : vector<16x128xf32>
    %125 = math.tanh %124 : vector<16x128xf32>
    %cst_57 = arith.constant 1.000000e+00 : f32
    %126 = vector.broadcast %cst_57 : f32 to vector<16x128xf32>
    %127 = arith.addf %126, %125 : vector<16x128xf32>
    %cst_58 = arith.constant 5.000000e-01 : f32
    %128 = vector.broadcast %cst_58 : f32 to vector<16x128xf32>
    %129 = arith.mulf %128, %127 : vector<16x128xf32>
    %130 = arith.mulf %117, %129 : vector<16x128xf32>
    %131 = arith.truncf %130 : vector<16x128xf32> to vector<16x128xbf16>
    %c0_59 = arith.constant 0 : index
    %c0_60 = arith.constant 0 : index
    %c0_61 = arith.constant 0 : index
    %132 = vector.load %arg13[%c0_59, %c0_60, %c0_61] : memref<1x128x32xbf16, #tpu.memory_space<vmem>>, vector<1x128x32xbf16>
    %133 = vector.shape_cast %132 : vector<1x128x32xbf16> to vector<128x32xbf16>
    %cst_62 = arith.constant dense<0.000000e+00> : vector<16x32xf32>
    %134 = tpu.matmul %131, %133, %cst_62 {dimension_numbers = #tpu.dot_dimension_numbers<[1], [0], [0], [1], [0, 0, 1, 1], [], []>} : vector<16x128xbf16>, vector<128x32xbf16>, vector<16x32xf32> -> vector<16x32xf32>
    %135 = arith.addf %110, %134 : vector<16x32xf32>
    %136 = arith.addf %82, %135 : vector<16x32xf32>
    %c0_63 = arith.constant 0 : index
    %c0_64 = arith.constant 0 : index
    %c0_65 = arith.constant 0 : index
    %137 = vector.load %arg14[%c0_63, %c0_64, %c0_65] : memref<1x1x32xf32, #tpu.memory_space<vmem>>, vector<1x1x32xf32>
    %138 = vector.shape_cast %137 : vector<1x1x32xf32> to vector<1x32xf32>
    %139 = vector.broadcast %138 : vector<1x32xf32> to vector<16x32xf32>
    %140 = arith.addf %136, %139 : vector<16x32xf32>
    %c0_66 = arith.constant 0 : index
    %c0_67 = arith.constant 0 : index
    %141 = vector.load %arg15[%c0_66, %c0_67] : memref<1x32xf32, #tpu.memory_space<vmem>>, vector<1x32xf32>
    %c0_68 = arith.constant 0 : index
    %c0_69 = arith.constant 0 : index
    %142 = vector.load %arg16[%c0_68, %c0_69] : memref<1x32xf32, #tpu.memory_space<vmem>>, vector<1x32xf32>
    %cst_70 = arith.constant dense<0.000000e+00> : vector<16xf32>
    %143 = vector.multi_reduction <add>, %140, %cst_70 [1] : vector<16x32xf32> to vector<16xf32>
    %144 = vector.shape_cast %143 : vector<16xf32> to vector<16x1xf32>
    %cst_71 = arith.constant 3.200000e+01 : f32
    %145 = vector.broadcast %cst_71 : f32 to vector<16x1xf32>
    %146 = arith.divf %144, %145 : vector<16x1xf32>
    %147 = arith.mulf %140, %140 : vector<16x32xf32>
    %cst_72 = arith.constant dense<0.000000e+00> : vector<16xf32>
    %148 = vector.multi_reduction <add>, %147, %cst_72 [1] : vector<16x32xf32> to vector<16xf32>
    %149 = vector.shape_cast %148 : vector<16xf32> to vector<16x1xf32>
    %cst_73 = arith.constant 3.200000e+01 : f32
    %150 = vector.broadcast %cst_73 : f32 to vector<16x1xf32>
    %151 = arith.divf %149, %150 : vector<16x1xf32>
    %152 = arith.mulf %146, %146 : vector<16x1xf32>
    %153 = arith.subf %151, %152 : vector<16x1xf32>
    %cst_74 = arith.constant 9.99999974E-6 : f32
    %154 = vector.broadcast %cst_74 : f32 to vector<16x1xf32>
    %155 = arith.addf %153, %154 : vector<16x1xf32>
    %156 = math.rsqrt %155 : vector<16x1xf32>
    %157 = vector.broadcast %146 : vector<16x1xf32> to vector<16x32xf32>
    %158 = arith.subf %140, %157 : vector<16x32xf32>
    %159 = vector.broadcast %156 : vector<16x1xf32> to vector<16x32xf32>
    %160 = vector.broadcast %141 : vector<1x32xf32> to vector<16x32xf32>
    %161 = arith.mulf %159, %160 : vector<16x32xf32>
    %162 = arith.mulf %158, %161 : vector<16x32xf32>
    %163 = vector.broadcast %142 : vector<1x32xf32> to vector<16x32xf32>
    %164 = arith.addf %162, %163 : vector<16x32xf32>
    %c0_75 = arith.constant 0 : index
    %c0_76 = arith.constant 0 : index
    %165 = vector.load %arg17[%c0_75, %c0_76] : memref<16x32xf32, #tpu.memory_space<vmem>>, vector<16x32xf32>
    tpu.vector_store %arg17[%c0_75, %c0_76], %164 {strides = array<i32>} : memref<16x32xf32, #tpu.memory_space<vmem>>, vector<16x32xf32>,
    return
  }
  func.func @transform_0(%arg0: i32, %arg1: i32) -> (i32, i32) {
    %c0_i32 = arith.constant 0 : i32
    %c0_i32_0 = arith.constant 0 : i32
    return %arg0, %c0_i32 : i32, i32
  }
  func.func @transform_1(%arg0: i32, %arg1: i32) -> (i32, i32, i32) {
    %c0_i32 = arith.constant 0 : i32
    %c0_i32_0 = arith.constant 0 : i32
    %c0_i32_1 = arith.constant 0 : i32
    return %arg1, %c0_i32, %c0_i32_0 : i32, i32, i32
  }
  func.func @transform_2(%arg0: i32, %arg1: i32) -> (i32, i32, i32) {
    %c0_i32 = arith.constant 0 : i32
    %c0_i32_0 = arith.constant 0 : i32
    %c0_i32_1 = arith.constant 0 : i32
    return %arg1, %c0_i32, %c0_i32_0 : i32, i32, i32
  }
  func.func @transform_3(%arg0: i32, %arg1: i32) -> (i32, i32, i32) {
    %c0_i32 = arith.constant 0 : i32
    %c0_i32_0 = arith.constant 0 : i32
    %c0_i32_1 = arith.constant 0 : i32
    return %arg1, %c0_i32, %c0_i32_0 : i32, i32, i32
  }
  func.func @transform_4(%arg0: i32, %arg1: i32) -> (i32, i32, i32) {
    %c0_i32 = arith.constant 0 : i32
    %c0_i32_0 = arith.constant 0 : i32
    %c0_i32_1 = arith.constant 0 : i32
    return %arg1, %c0_i32, %c0_i32_0 : i32, i32, i32
  }
  func.func @transform_5(%arg0: i32, %arg1: i32) -> (i32, i32, i32) {
    %c0_i32 = arith.constant 0 : i32
    %c0_i32_0 = arith.constant 0 : i32
    %c0_i32_1 = arith.constant 0 : i32
    return %arg1, %c0_i32, %c0_i32_0 : i32, i32, i32
  }
  func.func @transform_6(%arg0: i32, %arg1: i32) -> (i32, i32, i32) {
    %c0_i32 = arith.constant 0 : i32
    %c0_i32_0 = arith.constant 0 : i32
    %c0_i32_1 = arith.constant 0 : i32
    return %arg1, %c0_i32, %c0_i32_0 : i32, i32, i32
  }
  func.func @transform_7(%arg0: i32, %arg1: i32) -> (i32, i32, i32) {
    %c0_i32 = arith.constant 0 : i32
    %c0_i32_0 = arith.constant 0 : i32
    %c0_i32_1 = arith.constant 0 : i32
    return %arg1, %c0_i32, %c0_i32_0 : i32, i32, i32
  }
  func.func @transform_8(%arg0: i32, %arg1: i32) -> (i32, i32, i32) {
    %c0_i32 = arith.constant 0 : i32
    %c0_i32_0 = arith.constant 0 : i32
    %c0_i32_1 = arith.constant 0 : i32
    return %arg1, %c0_i32, %c0_i32_0 : i32, i32, i32
  }
  func.func @transform_9(%arg0: i32, %arg1: i32) -> (i32, i32, i32) {
    %c0_i32 = arith.constant 0 : i32
    %c0_i32_0 = arith.constant 0 : i32
    %c0_i32_1 = arith.constant 0 : i32
    return %arg1, %c0_i32, %c0_i32_0 : i32, i32, i32
  }
  func.func @transform_10(%arg0: i32, %arg1: i32) -> (i32, i32, i32) {
    %c0_i32 = arith.constant 0 : i32
    %c0_i32_0 = arith.constant 0 : i32
    %c0_i32_1 = arith.constant 0 : i32
    return %arg1, %c0_i32, %c0_i32_0 : i32, i32, i32
  }
  func.func @transform_11(%arg0: i32, %arg1: i32) -> (i32, i32, i32) {
    %c0_i32 = arith.constant 0 : i32
    %c0_i32_0 = arith.constant 0 : i32
    %c0_i32_1 = arith.constant 0 : i32
    return %arg1, %c0_i32, %c0_i32_0 : i32, i32, i32
  }
  func.func @transform_12(%arg0: i32, %arg1: i32) -> (i32, i32, i32) {
    %c0_i32 = arith.constant 0 : i32
    %c0_i32_0 = arith.constant 0 : i32
    %c0_i32_1 = arith.constant 0 : i32
    return %arg1, %c0_i32, %c0_i32_0 : i32, i32, i32
  }
  func.func @transform_13(%arg0: i32, %arg1: i32) -> (i32, i32) {
    %c0_i32 = arith.constant 0 : i32
    %c0_i32_0 = arith.constant 0 : i32
    %c0_i32_1 = arith.constant 0 : i32
    return %c0_i32, %c0_i32_0 : i32, i32
  }
  func.func @transform_14(%arg0: i32, %arg1: i32) -> (i32, i32) {
    %c0_i32 = arith.constant 0 : i32
    %c0_i32_0 = arith.constant 0 : i32
    %c0_i32_1 = arith.constant 0 : i32
    return %c0_i32, %c0_i32_0 : i32, i32
  }
  func.func @transform_15(%arg0: i32, %arg1: i32) -> (i32, i32) {
    %c0_i32 = arith.constant 0 : i32
    %c0_i32_0 = arith.constant 0 : i32
    return %arg0, %c0_i32 : i32, i32
  }
}

</mosaic_0001>

<bundles_post_ra>
// kernel: tpu_custom_call.1
= control target key start
LH: loop header
LB: loop body
LE: loop exit
PB: predicated region body
PF: predicated region fallthrough
CT: control target
= control target key end

     0   :  { %s1929_s0 = inlined_call_operand.vmem [shape: f32[16,32], index: 0, kind: input, shape index: {}]   ;;  %s1930_s1 = inlined_call_operand.vmem [shape: f32[2,1,32], index: 1, kind: input, shape index: {}]   ;;  %s1931_s2 = inlined_call_operand.vmem [shape: f32[2,1,32], index: 2, kind: input, shape index: {}]   ;;  %s1932_s3 = inlined_call_operand.vmem [shape: bf16[2,8,16], index: 3, kind: input, shape index: {}]   ;;  %s1933_s4 = inlined_call_operand.vmem [shape: f32[2,16,1], index: 4, kind: input, shape index: {}]   ;;  %s1934_s5 = inlined_call_operand.vmem [shape: bf16[2,16,8], index: 5, kind: input, shape index: {}]   ;;  %s1935_s6 = inlined_call_operand.vmem [shape: f32[2,8,1], index: 6, kind: input, shape index: {}]   ;;  %s1936_s7 = inlined_call_operand.vmem [shape: f32[2,1,32], index: 7, kind: input, shape index: {}]   ;;  %s1937_s8 = inlined_call_operand.vmem [shape: f32[2,1,32], index: 8, kind: input, shape index: {}]   ;;  %s1938_s9 = inlined_call_operand.vmem [shape: bf16[2,32,128], index: 9, kind: input, shape index: {}]   ;;  %s1939_s10 = inlined_call_operand.vmem [shape: f32[2,1,128], index: 10, kind: input, shape index: {}]   ;;  %s1940_s11 = inlined_call_operand.vmem [shape: bf16[2,128,32], index: 11, kind: input, shape index: {}]   ;;  %s1941_s12 = inlined_call_operand.vmem [shape: f32[2,1,32], index: 12, kind: input, shape index: {}]   ;;  %s1942_s13 = inlined_call_operand.vmem [shape: f32[1,32], index: 13, kind: input, shape index: {}]   ;;  %s1943_s14 = inlined_call_operand.vmem [shape: f32[1,32], index: 14, kind: input, shape index: {}]   ;;  %s1944_s15 = inlined_call_operand.hbm [shape: f32[16,32], index: 15, kind: output, shape index: {}]  }
   0x1   :  { %1947 = sst [smem:[#allocation8_spill]] %s1930_s1 }
   0x2   :  { %1948 = sst [smem:[#allocation9_spill]] %s1932_s3 }
   0x3   :  { %1949 = sst [smem:[#allocation10_spill]] %s1933_s4 }
   0x4   :  { %1950 = sst [smem:[#allocation11_spill]] %s1934_s5 }
   0x5   :  { %1951 = sst [smem:[#allocation12_spill]] %s1942_s13 }
   0x6   :  { %1952 = sst [smem:[#allocation13_spill]] %s1943_s14 }
   0x7   :  { %1953 = sst [smem:[#allocation14_spill]] %s1944_s15 }
   0x8   :  { %20 = vsyncpa [#allocation3], 0  ;;  %s1704_s18 = smov 0   ;;  %s1706_s19 = smov 0  }
   0x9   :  { %s1708_s20 = smov 0  }
   0xa LB: > { %1954 = sst [smem:[#allocation5_spill]] %s1613_s19  ;;  %s35_s22 = sadd.s32 1, %s1613_s19  ;;  %s1617_s20 = sphi %s1708_s20, %s26_s20   ;;  %s1613_s19 = sphi %s1706_s19, %s1972_s19   ;;  %s1609_s18 = sphi %s1704_s18, %s1971_s18  }
   0xb   : > { %1955 = sst [smem:[#allocation6_spill]] %s1617_s20  ;;  %p36_p0 = scmp.ge.s32.totalorder %s35_s22, 2 }
   0xc   : > { %p1411_p1 = scmp.ge.s32.totalorder %s1617_s20, 1  ;;  %p557_p2 = scmp.lt.s32.totalorder %s1617_s20, 3 }
   0xd   : > { %s1974_s22 = smov (%p36_p0, %s35_s22), 0 }
   0xe   : > { %1956 = sst [smem:[#allocation7_spill]] %s1974_s22  ;;  %p558_p3 = pnand %p1411_p1, %p557_p2 }
   0xf   : > { %p652_p4 = scmp.lt.s32.totalorder (!%p558_p3), %s1609_s18, 1  ;;  %s1958_s3 = sld [smem:[#allocation9_spill]] (!%p558_p3) }
  0x10   : > { %561 = sbr.rel (%p558_p3) target bundleno = 1312 (0x520), region = 80  ;;  %s1959_s4 = sld [smem:[#allocation10_spill]] (!%p558_p3) }
  0x11   : > { %s1960_s5 = sld [smem:[#allocation11_spill]] (!%p558_p3)  ;;  %p1422_p5 = scmp.ne.s32.totalorder (!%p558_p3), %s1609_s18, 0 }
  0x15   : > { %s1727_s23 = scalar_select %p652_p4, %s1609_s18, 1 }
  0x17   : > { %s1412_s30 = sshll.u32 %s1727_s23, 2  ;;  %s1476_s16 = sshll.u32 %s1727_s23, 4 }
  0x18   : > { %s661_s24 = scalar_lea.vmem %s1958_s3, %s1412_s30  ;;  %s1745_s19 = scalar_lea.vmem %s1959_s4, %s1476_s16 }
  0x19   : > { %s1477_s15 = sshll.u32 %s1727_s23, 3  ;;  %s681_s22 = scalar_lea.vmem %s1937_s8, %s1727_s23 }
  0x1a   : > { %s1755_s27 = scalar_lea.vmem %s1960_s5, %s1477_s15  ;;  %s1760_s21 = scalar_lea.vmem %s1935_s6, %s1477_s15 }
  0x1b   : > { %s1769_s4 = scalar_lea.vmem %s1938_s9, %s1476_s16  ;;  %s689_s1 = scalar_lea.vmem %s1939_s10, %s1727_s23 }
  0x1c   : > { %s1479_s13 = sshll.u32 %s1727_s23, 6  ;;  %s697_s30 = scalar_lea.vmem %s1941_s12, %s1727_s23 }
  0x1d   : > { %s1779_s29 = scalar_lea.vmem %s1940_s11, %s1479_s13  ;;  %703 = sbr.rel (%p1422_p5) target bundleno = 37 (0x25), region = 84 }
  0x22   : > { %v704_v0 = vld [vmem:[%s1929_s0] sm:$0xff]  ;;  %vm706_vm0 = vcmask 261120   ;;  %v705_v1 = vld [vmem:[%s1929_s0 + $0x8] sm:$0xff] }
  0x23   : > { %707 = vst.msk [vmem:[#allocation2] sm:$0xff] %vm706_vm0, %v704_v0 }
  0x24   : > { %708 = vst.msk [vmem:[#allocation2 + $0x8] sm:$0xff] %vm706_vm0, %v705_v1 }
  0x25 PF: > { %v781_v2 = vld [vmem:[%s661_s24] sm:$0xf]  ;;  %vm713_vm1 = vcmask 261120   ;;  %v785_v4 = vld [vmem:[%s1745_s19 + $0x8] sm:$0xff]  ;;  %v1619_v6 = vmov 0   ;;  %v1620_v13 = vmov 32.0   ;;  %s1964_s20 = scalar_lea.vmem %s1936_s7, %s1727_s23 }
  0x26   : > { %797 = vxpose.xlu1.c.b16.start.end [1/1] (short) (narrow) %v781_v2, 16  ;;  %1527 = vset.pattern.permute.xlu2 %v1619_v6  ;;  %1537 = vrcp.f32 %v1620_v13  ;;  %v786_v19 = vld [vmem:[%s1760_s21] sm:$0xff]  ;;  %s1961_s26 = sld [smem:[#allocation8_spill]]  ;;  %vm817_vm6 = vcmask 1043456   ;;  %vm813_vm7 = vcmask 64512   ;;  %vm881_vm11 = vcmask 130048  }
  0x27   : > { %794 = vperm.xlu2 %1527, %v785_v4   ;;  %v1480_v26 = vld [vmem:[%s1755_s27] sm:$0xff]  ;;  %s1965_s3 = sld [smem:[#allocation12_spill]]  ;;  %s1621_s18 = smov [#allocation2]  }
  0x28   : > { %v784_v32 = vld [vmem:[%s1745_s19] sm:$0xff]  ;;  %s1963_s19 = scalar_lea.vmem %s1931_s2, %s1727_s23  ;;  %s1966_s25 = sld [smem:[#allocation13_spill]] }
  0x29   : > { %v1530_v40 = vld [vmem:[%s1963_s19] ss:$0 sm:$0xff]  ;;  %s1967_s5 = sld [smem:[#allocation6_spill]]  ;;  %s1622_s14 = smov 128  }
  0x2a   : > { %v1792_v3 = vld [vmem:[#allocation2] sm:$0xff]  ;;  %s1968_s21 = sld [smem:[#allocation14_spill]] }
  0x2b   : > { %v714_v5 = vsel %vm713_vm1, %v1792_v3, 0.0  ;;  %v729_v7 = vmul.f32 %v1792_v3, %v1792_v3  ;;  %v1800_v9 = vld [vmem:[#allocation2 + $0x8] sm:$0xff] }
  0x2c   : > { %715 = vadd.xlane.f32.xlu0 %v714_v5  ;;  %v730_v10 = vmul.f32 %v1800_v9, %v1800_v9  ;;  %v717_v12 = vsel %vm713_vm1, %v1800_v9, 0.0  ;;  %v1538_v14 = vpop.eup %1537  ;;  %s1962_s24 = scalar_lea.vmem %s1961_s26, %s1727_s23  ;;  %s1222_s26 = sshll.u32 %s1621_s18, 4  ;;  %s1223_s26 = int_to_ptr.vmem [resolvable:$true] %s1222_s26 }
  0x2d   : > { %v731_v8 = vsel %vm713_vm1, %v729_v7, 0.0  ;;  %v721_v15 = vmul.f32 32.0, %v1538_v14  ;;  %vm725_vm2 = vweird.f32 %v1538_v14  ;;  %v1529_v35 = vld [vmem:[%s1962_s24] ss:$0 sm:$0xff] }
  0x2e   : > { %v734_v11 = vsel %vm713_vm1, %v730_v10, 0.0 }
  0x2f   : > { %v722_v16 = vsub.f32 1.0, %v721_v15 }
  0x30   : > { %s1224_s19 = sshll.u32 %s1968_s21, 4  ;;  %s1225_s19 = int_to_ptr.hbm [resolvable:$true] %s1224_s19 }
  0x31   : > { %v723_v17 = vmul.f32 %v1538_v14, %v722_v16 }
  0x33   : > { %v724_v18 = vadd.f32 %v1538_v14, %v723_v17 }
  0x34   : > { %732 = vadd.xlane.f32.xlu0 %v731_v8 }
  0x35   : > { %v1808_v20 = vsel %vm725_vm2, %v1538_v14, %v724_v18 }
  0x3c   : > { %735 = vadd.xlane.f32.xlu0 %v734_v11 }
  0x50   : > { %718 = vadd.xlane.f32.xlu2 %v717_v12 }
  0x65   : > { %865 = vxpose.xlu0.c.b16.start.end [1/1] (short) (narrow) %v1480_v26, 16 }
  0x68   : > { %856 = vperm.xlu2 %1527, %v786_v19  }
  0x79   : > { %1526 = vset.pattern.permute.xlu1 %v1619_v6 }
  0x80   : > { %789 = vperm.xlu1 %1526, %v784_v32  }
  0x81   : > { %v1827_v46 = vpop.permute.xlu2 %794 }
  0x9f   : > { %v716_v21 = vpop.xlane.xlu0 %715 }
  0xa0   : > { %v727_v22 = vmul.f32 %v1808_v20, %v716_v21 }
  0xa2   : > { %v739_v23 = vmul.f32 %v727_v22, %v727_v22  ;;  %v765_v38 = vsub.f32 %v1792_v3, %v727_v22 }
  0xa7   : > { %v733_v24 = vpop.xlane.xlu0 %732 }
  0xa8   : > { %v737_v25 = vmul.f32 %v733_v24, %v1808_v20 }
  0xaa   : > { %v741_v27 = vsub.f32 %v737_v25, %v739_v23 }
  0xac   : > { %v743_v28 = vadd.f32 1e-05, %v741_v27 }
  0xae   : > { %1539 = vrsqrt.f32 %v743_v28  ;;  %vm751_vm3 = vweird.f32 %v743_v28 }
  0xaf   : > { %v736_v49 = vpop.xlane.xlu0 %735 }
  0xb0   : > { %v738_v51 = vmul.f32 %v736_v49, %v1808_v20 }
  0xb4   : > { %v1540_v29 = vpop.eup %1539 }
  0xb5   : > { %v746_v30 = vmul.f32 %v1540_v29, %v743_v28  ;;  %vm752_vm4 = vweird.f32 %v1540_v29 }
  0xb6   : > { %vm753_vm5 = vmor %vm751_vm3, %vm752_vm4 }
  0xb7   : > { %v747_v31 = vmul.f32 %v1540_v29, %v746_v30 }
  0xb9   : > { %v748_v33 = vmul.f32 0.5, %v747_v31 }
  0xbb   : > { %v749_v34 = vsub.f32 1.5, %v748_v33 }
  0xbd   : > { %v750_v36 = vmul.f32 %v1540_v29, %v749_v34 }
  0xbf   : > { %v754_v37 = vsel %vm753_vm5, %v1540_v29, %v750_v36 }
  0xc0   : > { %v770_v39 = vmul.f32 %v1529_v35, %v754_v37 }
  0xc2   : > { %v772_v41 = vmul.f32 %v770_v39, %v765_v38 }
  0xc3   : > { %v719_v47 = vpop.xlane.xlu2 %718 }
  0xc4   : > { %v777_v42 = vadd.f32 %v1530_v40, %v772_v41  ;;  %v728_v48 = vmul.f32 %v1808_v20, %v719_v47 }
  0xc6   : > { %v779_v43 = vpack.c.bf16 %v777_v42, %v777_v42  ;;  %v740_v50 = vmul.f32 %v728_v48, %v728_v48  ;;  %v766_v14 = vsub.f32 %v1800_v9, %v728_v48 }
  0xc8   : > { %v819_v44 = vsel %vm817_vm6, %v779_v43, 0  ;;  %v742_v52 = vsub.f32 %v738_v51, %v740_v50 }
  0xc9   : > { %828 = vmatpush.bf16.msra.mxu0 %v819_v44 }
  0xca   : > { %v744_v53 = vadd.f32 1e-05, %v742_v52 }
  0xcb   : > { %v857_v31 = vpop.permute.xlu2 %856 }
  0xcc   : > { %1528 = vset.pattern.permute.xlu0 %v1619_v6  ;;  %1541 = vrsqrt.f32 %v744_v53  ;;  %vm761_vm8 = vweird.f32 %v744_v53 }
  0xd2   : > { %v805_v45 = vpop.trf.xlu1  ;;  %v1542_v54 = vpop.eup %1541 }
  0xd3   : > { %1423 = vmatmul.msk.bf16.vlgmr.msra.gmra.mxu0 %vm813_vm7, %v805_v45  ;;  %v756_v55 = vmul.f32 %v1542_v54, %v744_v53  ;;  %vm762_vm9 = vweird.f32 %v1542_v54 }
  0xd4   : > { %vm763_vm10 = vmor %vm761_vm8, %vm762_vm9 }
  0xd5   : > { %v757_v58 = vmul.f32 %v1542_v54, %v756_v55 }
  0xd7   : > { %v758_v61 = vmul.f32 0.5, %v757_v58 }
  0xd9   : > { %v759_v1 = vsub.f32 1.5, %v758_v61 }
  0xdb   : > { %v760_v8 = vmul.f32 %v1542_v54, %v759_v1 }
  0xdd   : > { %v764_v12 = vsel %vm763_vm10, %v1542_v54, %v760_v8 }
  0xde   : > { %v771_v15 = vmul.f32 %v1529_v35, %v764_v12 }
  0xe0   : > { %v773_v18 = vmul.f32 %v771_v15, %v766_v14  ;;  %v1481_v14 = vld [vmem:[%s1769_s4] sm:$0xff] }
  0xe2   : > { %v778_v23 = vadd.f32 %v1530_v40, %v773_v18 }
  0xe4   : > { %v780_v27 = vpack.c.bf16 %v778_v23, %v778_v23 }
  0xe6   : > { %v899_v29 = vsel %vm817_vm6, %v780_v27, 0 }
  0xf2   : > { %v790_v56 = vpop.permute.xlu1 %789 }
 0x111   : > { %v873_v30 = vpop.trf.xlu0 }
 0x150   : > { %v830_v57 = vpop.f32.mrf.mxu0 }
 0x151   : > { %v831_v59 = vadd.f32 %v830_v57, %v790_v56 }
 0x153   : > { %v835_v60 = vmul.f32 %v831_v59, %v831_v59 }
 0x155   : > { %v837_v62 = vmul.f32 %v835_v60, %v831_v59 }
 0x157   : > { %v839_v63 = vmul.f32 0.044715, %v837_v62 }
 0x158   : > { %v832_v0 = vpop.f32.mrf.mxu0 }
 0x159   : > { %v833_v2 = vadd.f32 %v832_v0, %v1827_v46  ;;  %v841_v4 = vadd.f32 %v839_v63, %v831_v59 }
 0x15b   : > { %v836_v5 = vmul.f32 %v833_v2, %v833_v2  ;;  %v843_v6 = vmul.f32 0.7978846, %v841_v4 }
 0x15d   : > { %v838_v7 = vmul.f32 %v836_v5, %v833_v2  ;;  %1543 = vtanh.f32 %v843_v6 }
 0x15f   : > { %v840_v10 = vmul.f32 0.044715, %v838_v7 }
 0x161   : > { %v842_v11 = vadd.f32 %v840_v10, %v833_v2 }
 0x163   : > { %v844_v13 = vmul.f32 0.7978846, %v842_v11  ;;  %v1544_v16 = vpop.eup %1543 }
 0x164   : > { %v847_v17 = vadd.f32 1.0, %v1544_v16 }
 0x165   : > { %1545 = vtanh.f32 %v844_v13  ;;  %v1482_v13 = vld [vmem:[%s1769_s4 + $0x8] sm:$0xff]  ;;  %s1969_s4 = sadd.s32 4294967295, %s1967_s5  }
 0x166   : > { %v849_v22 = vmul.f32 0.5, %v847_v17  ;;  %1039 = vmatpush.bf16.msrb.mxu0 %v1482_v13  ;;  %p1495_p6 = scmp.eq.s32.totalorder %s1969_s4, 1 }
 0x168   : > { %v851_v25 = vmul.f32 %v849_v22, %v831_v59 }
 0x16a   : > { %1040 = vmatpush.bf16.msrb.mxu0 %v1481_v14 }
 0x16b   : > { %v1546_v19 = vpop.eup %1545 }
 0x16c   : > { %v848_v21 = vadd.f32 1.0, %v1546_v19 }
 0x16e   : > { %v850_v24 = vmul.f32 0.5, %v848_v21 }
 0x170   : > { %v852_v26 = vmul.f32 %v850_v24, %v833_v2 }
 0x172   : > { %v853_v28 = vpack.c.bf16 %v852_v26, %v851_v25 }
 0x174   : > { %892 = vmatpush.bf16.msra.mxu2 %v853_v28 }
 0x177   : > { %1428 = vmatmul.msk.bf16.vlgmr.msra.gmra.mxu2 %vm881_vm11, %v873_v30 }
 0x178   : > { %908 = vmatpush.bf16.msrb.mxu2 %v899_v29 }
 0x187   : > { %1429 = vmatmul.msk.bf16.vlgmr.msrb.gmra.mxu2 %vm813_vm7, %v805_v45 }
 0x1fa   : > { %v894_v32 = vpop.f32.mrf.mxu2 }
 0x1fb   : > { %v895_v33 = vadd.f32 %v894_v32, %v857_v31 }
 0x1fd   : > { %v1837_v34 = vadd.f32 %v895_v33, %v1792_v3 }
 0x1ff   : > { %v951_v35 = vsel %vm713_vm1, %v1837_v34, 0.0  ;;  %v959_v36 = vmul.f32 %v1837_v34, %v1837_v34 }
 0x200   : > { %952 = vadd.xlane.f32.xlu0 %v951_v35 }
 0x201   : > { %v961_v37 = vsel %vm713_vm1, %v959_v36, 0.0 }
 0x202   : > { %v896_v38 = vpop.f32.mrf.mxu2  ;;  %962 = vadd.xlane.f32.xlu1 %v961_v37 }
 0x20a   : > { %v910_v39 = vpop.f32.mrf.mxu2 }
 0x20b   : > { %v911_v40 = vadd.f32 %v910_v39, %v790_v56 }
 0x20d   : > { %v915_v41 = vmul.f32 %v911_v40, %v911_v40 }
 0x20f   : > { %v917_v42 = vmul.f32 %v915_v41, %v911_v40 }
 0x211   : > { %v919_v43 = vmul.f32 0.044715, %v917_v42 }
 0x212   : > { %v912_v44 = vpop.f32.mrf.mxu2 }
 0x213   : > { %v913_v3 = vadd.f32 %v912_v44, %v1827_v46  ;;  %v921_v45 = vadd.f32 %v919_v43, %v911_v40  ;;  %v1532_v43 = vld [vmem:[%s681_s22] ss:$0 sm:$0xff] }
 0x215   : > { %v916_v47 = vmul.f32 %v913_v3, %v913_v3  ;;  %v923_v48 = vmul.f32 0.7978846, %v921_v45 }
 0x217   : > { %v918_v49 = vmul.f32 %v916_v47, %v913_v3  ;;  %1547 = vtanh.f32 %v923_v48  ;;  %v1490_v48 = vld [vmem:[%s1779_s29 + $0x38] sm:$0xff] }
 0x218   : > { %1130 = vmatpush.bf16.msra.mxu1 %v1490_v48 }
 0x219   : > { %v920_v50 = vmul.f32 0.044715, %v918_v49  ;;  %v1489_v49 = vld [vmem:[%s1779_s29 + $0x30] sm:$0xff] }
 0x21b   : > { %v922_v51 = vadd.f32 %v920_v50, %v913_v3  ;;  %v1488_v50 = vld [vmem:[%s1779_s29 + $0x28] sm:$0xff] }
 0x21c   : > { %1131 = vmatpush.bf16.msra.mxu1 %v1489_v49 }
 0x21d   : > { %v924_v52 = vmul.f32 0.7978846, %v922_v51  ;;  %v1548_v53 = vpop.eup %1547  ;;  %v1487_v51 = vld [vmem:[%s1779_s29 + $0x20] sm:$0xff] }
 0x21e   : > { %v927_v54 = vadd.f32 1.0, %v1548_v53  ;;  %v1485_v53 = vld [vmem:[%s1779_s29 + $0x10] sm:$0xff] }
 0x21f   : > { %1549 = vtanh.f32 %v924_v52  ;;  %v1486_v52 = vld [vmem:[%s1779_s29 + $0x18] sm:$0xff] }
 0x220   : > { %v929_v56 = vmul.f32 0.5, %v927_v54  ;;  %1132 = vmatpush.bf16.msra.mxu1 %v1488_v50  ;;  %v1484_v54 = vld [vmem:[%s1779_s29 + $0x8] sm:$0xff] }
 0x222   : > { %v931_v59 = vmul.f32 %v929_v56, %v911_v40 }
 0x224   : > { %1133 = vmatpush.bf16.msra.mxu1 %v1487_v51  ;;  %v1535_v51 = vld [vmem:[%s1965_s3] ss:$0 sm:$0xff] }
 0x225   : > { %v1550_v55 = vpop.eup %1549 }
 0x226   : > { %v928_v57 = vadd.f32 1.0, %v1550_v55  ;;  %v1533_v55 = vld [vmem:[%s689_s1] ss:$0 sm:$0xff] }
 0x228   : > { %v930_v58 = vmul.f32 0.5, %v928_v57  ;;  %1134 = vmatpush.bf16.msra.mxu1 %v1486_v52  ;;  %v1483_v57 = vld [vmem:[%s1779_s29] sm:$0xff] }
 0x22a   : > { %v932_v60 = vmul.f32 %v930_v58, %v913_v3 }
 0x22c   : > { %v933_v61 = vpack.c.bf16 %v932_v60, %v931_v59  ;;  %1135 = vmatpush.bf16.msra.mxu1 %v1485_v53 }
 0x22e   : > { %941 = vmatpush.bf16.msra.mxu3 %v933_v61 }
 0x230   : > { %1136 = vmatpush.bf16.msra.mxu1 %v1484_v54 }
 0x231   : > { %1430 = vmatmul.msk.bf16.vlgmr.msra.gmra.mxu3 %vm881_vm11, %v873_v30 }
 0x234   : > { %1137 = vmatpush.bf16.msra.mxu1 %v1483_v57  ;;  %v1536_v57 = vld [vmem:[%s1966_s25] ss:$0 sm:$0xff] }
 0x273   : > { %v953_v5 = vpop.xlane.xlu0 %952 }
 0x274   : > { %v957_v6 = vmul.f32 %v953_v5, %v1808_v20 }
 0x275   : > { %v963_v7 = vpop.xlane.xlu1 %962 }
 0x276   : > { %v969_v8 = vmul.f32 %v957_v6, %v957_v6  ;;  %v995_v38 = vsub.f32 %v1837_v34, %v957_v6 }
 0x2b4   : > { %v943_v46 = vpop.f32.mrf.mxu3 }
 0x2b5   : > { %v944_v62 = vadd.f32 %v943_v46, %v857_v31  ;;  %v1531_v31 = vld [vmem:[%s1964_s20] ss:$0 sm:$0xff]  ;;  %s1623_s20 = smov 8  }
 0x2b7   : > { %v1847_v63 = vadd.f32 %v944_v62, %v1800_v9  ;;  %v967_v9 = vmul.f32 %v963_v7, %v1808_v20 }
 0x2b9   : > { %v954_v0 = vsel %vm713_vm1, %v1847_v63, 0.0  ;;  %v960_v2 = vmul.f32 %v1847_v63, %v1847_v63  ;;  %v971_v10 = vsub.f32 %v967_v9, %v969_v8 }
 0x2ba   : > { %955 = vadd.xlane.f32.xlu2 %v954_v0 }
 0x2bb   : > { %v964_v4 = vsel %vm713_vm1, %v960_v2, 0.0  ;;  %v973_v11 = vadd.f32 1e-05, %v971_v10 }
 0x2bc   : > { %v945_v1 = vpop.f32.mrf.mxu3 }
 0x2bd   : > { %1551 = vrsqrt.f32 %v973_v11  ;;  %vm981_vm13 = vweird.f32 %v973_v11 }
 0x2c2   : > { %965 = vadd.xlane.f32.xlu2 %v964_v4 }
 0x2c3   : > { %v1552_v15 = vpop.eup %1551 }
 0x2c4   : > { %v976_v17 = vmul.f32 %v1552_v15, %v973_v11  ;;  %vm982_vm12 = vweird.f32 %v1552_v15 }
 0x2c5   : > { %vm983_vm14 = vmor %vm981_vm13, %vm982_vm12 }
 0x2c6   : > { %v977_v22 = vmul.f32 %v1552_v15, %v976_v17  ;;  %v1534_v17 = vld [vmem:[%s697_s30] ss:$0 sm:$0xff] }
 0x2c8   : > { %v978_v25 = vmul.f32 0.5, %v977_v22 }
 0x2ca   : > { %v979_v26 = vsub.f32 1.5, %v978_v25 }
 0x2cc   : > { %v980_v28 = vmul.f32 %v1552_v15, %v979_v26 }
 0x2ce   : > { %v984_v32 = vsel %vm983_vm14, %v1552_v15, %v980_v28 }
 0x2cf   : > { %v1000_v36 = vmul.f32 %v1531_v31, %v984_v32 }
 0x2d1   : > { %v1002_v42 = vmul.f32 %v1000_v36, %v995_v38 }
 0x2d3   : > { %v1007_v3 = vadd.f32 %v1532_v43, %v1002_v42 }
 0x32d   : > { %v956_v12 = vpop.xlane.xlu2 %955 }
 0x32e   : > { %v958_v16 = vmul.f32 %v956_v12, %v1808_v20 }
 0x330   : > { %v970_v19 = vmul.f32 %v958_v16, %v958_v16  ;;  %v996_v40 = vsub.f32 %v1847_v63, %v958_v16 }
 0x335   : > { %v966_v18 = vpop.xlane.xlu2 %965 }
 0x336   : > { %v968_v21 = vmul.f32 %v966_v18, %v1808_v20 }
 0x338   : > { %v972_v23 = vsub.f32 %v968_v21, %v970_v19 }
 0x33a   : > { %v974_v24 = vadd.f32 1e-05, %v972_v23 }
 0x33c   : > { %1553 = vrsqrt.f32 %v974_v24  ;;  %vm991_vm0 = vweird.f32 %v974_v24 }
 0x342   : > { %v1554_v27 = vpop.eup %1553 }
 0x343   : > { %v986_v29 = vmul.f32 %v1554_v27, %v974_v24  ;;  %vm992_vm15 = vweird.f32 %v1554_v27 }
 0x344   : > { %vm993_vm2 = vmor %vm991_vm0, %vm992_vm15 }
 0x345   : > { %v987_v30 = vmul.f32 %v1554_v27, %v986_v29 }
 0x347   : > { %v988_v33 = vmul.f32 0.5, %v987_v30 }
 0x349   : > { %v989_v35 = vsub.f32 1.5, %v988_v33 }
 0x34b   : > { %v990_v37 = vmul.f32 %v1554_v27, %v989_v35 }
 0x34d   : > { %v994_v39 = vsel %vm993_vm2, %v1554_v27, %v990_v37 }
 0x34e   : > { %v1001_v41 = vmul.f32 %v1531_v31, %v994_v39 }
 0x350   : > { %v1003_v44 = vmul.f32 %v1001_v41, %v996_v40 }
 0x352   : > { %v1008_v45 = vadd.f32 %v1532_v43, %v1003_v44 }
 0x354   : > { %v1009_v47 = vpack.c.bf16 %v1008_v45, %v1007_v3 }
 0x356   : > { %1439 = vmatmul.msk.bf16.vlgmr.msrb.gmra.mxu0 %vm713_vm1, %v1009_v47 }
 0x3d3   : > { %v1042_v56 = vpop.f32.mrf.mxu0 }
 0x3d4   : > { %v1043_v58 = vadd.f32 %v1533_v55, %v1042_v56 }
 0x3d6   : > { %v1047_v59 = vmul.f32 %v1043_v58, %v1043_v58 }
 0x3d8   : > { %v1049_v60 = vmul.f32 %v1047_v59, %v1043_v58 }
 0x3da   : > { %v1051_v61 = vmul.f32 0.044715, %v1049_v60 }
 0x3db   : > { %v1044_v46 = vpop.f32.mrf.mxu0 }
 0x3dc   : > { %v1053_v62 = vadd.f32 %v1051_v61, %v1043_v58  ;;  %v1045_v0 = vadd.f32 %v1533_v55, %v1044_v46 }
 0x3de   : > { %v1048_v1 = vmul.f32 %v1045_v0, %v1045_v0  ;;  %v1055_v2 = vmul.f32 0.7978846, %v1053_v62 }
 0x3e0   : > { %v1050_v4 = vmul.f32 %v1048_v1, %v1045_v0  ;;  %1555 = vtanh.f32 %v1055_v2 }
 0x3e2   : > { %v1052_v5 = vmul.f32 0.044715, %v1050_v4 }
 0x3e4   : > { %v1054_v6 = vadd.f32 %v1052_v5, %v1045_v0 }
 0x3e6   : > { %v1056_v7 = vmul.f32 0.7978846, %v1054_v6  ;;  %v1556_v8 = vpop.eup %1555 }
 0x3e7   : > { %v1059_v9 = vadd.f32 1.0, %v1556_v8 }
 0x3e8   : > { %1557 = vtanh.f32 %v1056_v7 }
 0x3e9   : > { %v1061_v12 = vmul.f32 0.5, %v1059_v9 }
 0x3eb   : > { %v1063_v14 = vmul.f32 %v1061_v12, %v1043_v58 }
 0x3ee   : > { %v1558_v10 = vpop.eup %1557 }
 0x3ef   : > { %v1060_v11 = vadd.f32 1.0, %v1558_v10 }
 0x3f1   : > { %v1062_v13 = vmul.f32 0.5, %v1060_v11 }
 0x3f3   : > { %v1064_v15 = vmul.f32 %v1062_v13, %v1045_v0 }
 0x3f5   : > { %v1065_v16 = vpack.c.bf16 %v1064_v15, %v1063_v14 }
 0x3f7   : > { %1138 = vmatmul.bf16.vlgmr.msra.gmra.mxu1 %v1065_v16 }
 0x474   : > { %v1139_v18 = vpop.f32.mrf.mxu1 }
 0x475   : > { %v1144_v19 = vadd.f32 %v1139_v18, %v1837_v34 }
 0x477   : > { %v1892_v21 = vadd.f32 %v1534_v17, %v1144_v19 }
 0x479   : > { %v1154_v22 = vsel %vm713_vm1, %v1892_v21, 0.0  ;;  %v1162_v34 = vmul.f32 %v1892_v21, %v1892_v21 }
 0x47a   : > { %1155 = vadd.xlane.f32.xlu2 %v1154_v22 }
 0x47b   : > { %v1164_v29 = vsel %vm713_vm1, %v1162_v34, 0.0 }
 0x47c   : > { %v1141_v23 = vpop.f32.mrf.mxu1 }
 0x47d   : > { %v1145_v24 = vadd.f32 %v1141_v23, %v1847_v63 }
 0x47f   : > { %v1151_v25 = vadd.f32 %v1534_v17, %v1145_v24 }
 0x481   : > { %v1157_v26 = vsel %vm713_vm1, %v1151_v25, 0.0  ;;  %v1163_v27 = vmul.f32 %v1151_v25, %v1151_v25 }
 0x482   : > { %1158 = vadd.xlane.f32.xlu2 %v1157_v26 }
 0x483   : > { %v1167_v28 = vsel %vm713_vm1, %v1163_v27, 0.0 }
 0x484   : > { %1168 = vadd.xlane.f32.xlu1 %v1167_v28 }
 0x48a   : > { %1165 = vadd.xlane.f32.xlu2 %v1164_v29 }
 0x4ed   : > { %v1156_v30 = vpop.xlane.xlu2 %1155 }
 0x4ee   : > { %v1160_v36 = vmul.f32 %v1156_v30, %v1808_v20 }
 0x4f0   : > { %v1172_v40 = vmul.f32 %v1160_v36, %v1160_v36  ;;  %v1198_v62 = vsub.f32 %v1892_v21, %v1160_v36 }
 0x4f5   : > { %v1159_v31 = vpop.xlane.xlu2 %1158 }
 0x4f6   : > { %v1161_v32 = vmul.f32 %v1159_v31, %v1808_v20 }
 0x4f7   : > { %v1169_v33 = vpop.xlane.xlu1 %1168 }
 0x4f8   : > { %v1173_v63 = vmul.f32 %v1161_v32, %v1161_v32  ;;  %v1171_v35 = vmul.f32 %v1169_v33, %v1808_v20  ;;  %v1199_v55 = vsub.f32 %v1151_v25, %v1161_v32 }
 0x4fa   : > { %v1175_v37 = vsub.f32 %v1171_v35, %v1173_v63 }
 0x4fc   : > { %v1177_v38 = vadd.f32 1e-05, %v1175_v37 }
 0x4fd   : > { %v1166_v39 = vpop.xlane.xlu2 %1165 }
 0x4fe   : > { %1559 = vrsqrt.f32 %v1177_v38  ;;  %v1170_v41 = vmul.f32 %v1166_v39, %v1808_v20  ;;  %vm1194_vm4 = vweird.f32 %v1177_v38 }
 0x500   : > { %v1174_v42 = vsub.f32 %v1170_v41, %v1172_v40 }
 0x502   : > { %v1176_v43 = vadd.f32 1e-05, %v1174_v42 }
 0x504   : > { %v1560_v44 = vpop.eup %1559  ;;  %1561 = vrsqrt.f32 %v1176_v43  ;;  %vm1184_vm7 = vweird.f32 %v1176_v43 }
 0x505   : > { %v1189_v3 = vmul.f32 %v1560_v44, %v1177_v38  ;;  %vm1195_vm3 = vweird.f32 %v1560_v44 }
 0x506   : > { %vm1196_vm5 = vmor %vm1194_vm4, %vm1195_vm3 }
 0x507   : > { %v1190_v45 = vmul.f32 %v1560_v44, %v1189_v3 }
 0x509   : > { %v1191_v47 = vmul.f32 0.5, %v1190_v45 }
 0x50a   : > { %v1562_v48 = vpop.eup %1561 }
 0x50b   : > { %v1192_v49 = vsub.f32 1.5, %v1191_v47  ;;  %v1179_v50 = vmul.f32 %v1562_v48, %v1176_v43  ;;  %vm1185_vm6 = vweird.f32 %v1562_v48 }
 0x50c   : > { %vm1186_vm8 = vmor %vm1184_vm7, %vm1185_vm6 }
 0x50d   : > { %v1193_v52 = vmul.f32 %v1560_v44, %v1192_v49  ;;  %v1180_v53 = vmul.f32 %v1562_v48, %v1179_v50 }
 0x50f   : > { %v1197_v20 = vsel %vm1196_vm5, %v1560_v44, %v1193_v52  ;;  %v1181_v54 = vmul.f32 0.5, %v1180_v53 }
 0x510   : > { %v1204_v56 = vmul.f32 %v1535_v51, %v1197_v20 }
 0x511   : > { %v1182_v58 = vsub.f32 1.5, %v1181_v54 }
 0x512   : > { %v1206_v59 = vmul.f32 %v1204_v56, %v1199_v55 }
 0x513   : > { %v1183_v60 = vmul.f32 %v1562_v48, %v1182_v58 }
 0x514   : > { %v1211_v61 = vadd.f32 %v1536_v57, %v1206_v59 }
 0x515   : > { %v1187_v46 = vsel %vm1186_vm8, %v1562_v48, %v1183_v60 }
 0x516   : > { %1213 = vst.msk [vmem:[#allocation2 + $0x8] sm:$0xff] %vm713_vm1, %v1211_v61  ;;  %v1203_v0 = vmul.f32 %v1535_v51, %v1187_v46 }
 0x518   : > { %v1205_v1 = vmul.f32 %v1203_v0, %v1198_v62 }
 0x51a   : > { %v1210_v2 = vadd.f32 %v1536_v57, %v1205_v1 }
 0x51c   : > { %1212 = vst.msk [vmem:[#allocation2] sm:$0xff] %vm713_vm1, %v1210_v2 }
 0x51d   : > { %1492 = dma.vmem_to_hbm [thread:$0]  (%p1495_p6), %s1223_s26, 256, %s1225_s19, [#allocation3], %s1622_s14, %s1622_s14, %s1623_s20  }
 0x51e   : > { %1604 = dma.done.wait (%p1495_p6), [#allocation3], 256  }
 0x51f   : > { %1606 = vsyncadd (%p1495_p6), [#allocation3], 4294967040 }
 0x520 PF: > { %s1970_s13 = sld [smem:[#allocation6_spill]] }
 0x521   : > { %s1971_s18 = sld [smem:[#allocation5_spill]] }
 0x522   : > { %s1972_s19 = sld [smem:[#allocation7_spill]] }
 0x526   : > { %s26_s20 = sadd.s32 1, %s1970_s13  }
 0x527   : > { %p23_p7 = scmp.ge.s32.totalorder %s26_s20, 4  }
 0x529   :  { %25 = sbr.rel (!%p23_p7) target bundleno = 10 (0xa), region = 148 }
 0x52e   :  { %1241 = vsyncpa [#allocation3], 1 }
 0x52f   :  { %1243 = vsyncpa [#allocation3 + $0x1], 1 }

</bundles_post_ra>
